<compile_context>
chip_gen: v7x
topology: tpu7x:2x2x1
jax: 0.10.0
libtpu: 0.0.40
codegen_flags: <defaults>
</compile_context>

<pallas_src>
import functools

import jax
import jax.numpy as jnp
from jax.experimental import pallas as pl
from jax.experimental.pallas import tpu as pltpu

_LANE = 128            # vreg lane width / MXU column granularity (all TPU gens)
_MAX_TM = 256          # v6e/v7x MXU is 2x256x256 (harmless on v5e's 4x128x128)
_MAX_TN = 512          # wide, lane-dense output tiles


def _round_up(x, m):
    return (x + m - 1) // m * m


def _pick_tn(n_pad, m_blocks):
    """Widest multiple-of-128 tile (<= _MAX_TN) dividing n_pad.  If there is
    only one M block, prefer >=2 N blocks so both v7x TensorCores get work."""
    tn = min(_MAX_TN, n_pad)
    while n_pad % tn:
        tn -= _LANE
    if m_blocks == 1 and n_pad > _LANE and n_pad // tn < 2:
        tn = (n_pad // 2) // _LANE * _LANE
        while n_pad % tn:
            tn -= _LANE
    return tn


# ---------------------------------------------------------------------------
# Kernels
# ---------------------------------------------------------------------------

def _mu_kernel_single_k(x_ref, w_ref, b_ref, o_ref):
    """Whole K reduction in one grid step: no accumulator scratch, no phasing.

    Activations are cast to the weight dtype in-register (bf16 path hits the
    native MXU rate; accumulation is f32 via preferred_element_type)."""
    acc = jnp.dot(x_ref[...].astype(w_ref.dtype), w_ref[...],
                  preferred_element_type=jnp.float32)
    o_ref[...] = (acc + b_ref[...]).astype(o_ref.dtype)


def _mu_kernel_multi_k(x_ref, w_ref, b_ref, o_ref, acc_ref):
    """K-tiled variant: one (tm, tn) output tile, grid axis 2 is the reduction."""
    k = pl.program_id(2)

    @pl.when(k == 0)
    def _():
        acc_ref[...] = jnp.zeros_like(acc_ref)

    acc_ref[...] += jnp.dot(x_ref[...].astype(w_ref.dtype), w_ref[...],
                            preferred_element_type=jnp.float32)

    @pl.when(k == pl.num_programs(2) - 1)
    def _():
        # Fused bias add + cast in the f32 epilogue (never touches bf16 VPU).
        o_ref[...] = (acc_ref[...] + b_ref[...]).astype(o_ref.dtype)


@functools.partial(jax.jit, static_argnames=("tm", "tn", "tk"))
def _matmul_bias(x_p, w_p, b_p, *, tm, tn, tk):
    """out = x_p @ w_p + b_p on padded, tile-aligned operands (f32 output)."""
    M, K = x_p.shape
    _, N = w_p.shape
    m_blocks, n_blocks, k_blocks = M // tm, N // tn, K // tk
    out_shape = jax.ShapeDtypeStruct((M, N), jnp.float32)

    if k_blocks == 1:
        # Single-K-step fast path: no scratch, no init/finalize branches,
        # 2-D grid with both axes parallel (megacore-shardable).
        return pl.pallas_call(
            _mu_kernel_single_k,
            out_shape=out_shape,
            grid_spec=pltpu.PrefetchScalarGridSpec(
                num_scalar_prefetch=0,
                grid=(m_blocks, n_blocks),
                in_specs=[
                    pl.BlockSpec((tm, tk), lambda i, j: (i, 0)),   # activations
                    pl.BlockSpec((tk, tn), lambda i, j: (0, j)),   # weights
                    pl.BlockSpec((1, tn), lambda i, j: (0, j)),    # bias (f32)
                ],
                out_specs=pl.BlockSpec((tm, tn), lambda i, j: (i, j)),
            ),
            compiler_params=pltpu.CompilerParams(
                dimension_semantics=("parallel", "parallel"),
            ),
        )(x_p, w_p, b_p)

    # General K-tiled path with an f32 VMEM accumulator.
    return pl.pallas_call(
        _mu_kernel_multi_k,
        out_shape=out_shape,
        grid_spec=pltpu.PrefetchScalarGridSpec(
            num_scalar_prefetch=0,
            grid=(m_blocks, n_blocks, k_blocks),
            in_specs=[
                pl.BlockSpec((tm, tk), lambda i, j, k: (i, k)),    # activations
                pl.BlockSpec((tk, tn), lambda i, j, k: (k, j)),    # weights
                pl.BlockSpec((1, tn), lambda i, j, k: (0, j)),     # bias (f32)
            ],
            out_specs=pl.BlockSpec((tm, tn), lambda i, j, k: (i, j)),
            scratch_shapes=[pltpu.VMEM((tm, tn), jnp.float32)],
        ),
        compiler_params=pltpu.CompilerParams(
            # M/N tiles are independent -> parallel (v7x: sharded over 2 TCs);
            # K carries the accumulator -> arbitrary (innermost grid axis).
            dimension_semantics=("parallel", "parallel", "arbitrary"),
        ),
    )(x_p, w_p, b_p)


# ---------------------------------------------------------------------------
# Module wrapper
# ---------------------------------------------------------------------------

class ConditionalDiracDelta:
    """JAX/Pallas port of the PyTorch ConditionalDiracDelta wrapper.

    `net` is the flatten + Linear encoder: mu = flatten(x) @ W + b.
    Weights are stored in `compute_dtype` (default bf16: native MXU dtype on
    every TPU generation, half the weight HBM traffic); accumulation and the
    bias epilogue are always f32.
    """

    def __init__(self, w, b, compute_dtype=jnp.bfloat16):
        w = jnp.asarray(w)
        b = jnp.asarray(b).reshape(1, -1)
        self.d_in, self.d_out = w.shape
        self.compute_dtype = jnp.dtype(compute_dtype)

        # K tile: as large as comfortably fits double-buffered VMEM so that
        # small/medium encoder widths reduce in a single grid step.
        max_tk = 2048 if self.compute_dtype.itemsize <= 2 else 1024
        k128 = _round_up(self.d_in, _LANE)
        if k128 <= max_tk:
            self.tk = k128
        else:
            n_k = -(-k128 // max_tk)                      # ceil-div
            self.tk = _round_up(-(-k128 // n_k), _LANE)   # balanced K tiles
        self.k_pad = _round_up(k128, self.tk)
        self.n_pad = _round_up(self.d_out, _LANE)         # lane-dense output

        # Pad W/b ONCE at init (zero rows/cols are mathematically inert).
        self.w_pad = jnp.pad(
            w, ((0, self.k_pad - self.d_in), (0, self.n_pad - self.d_out))
        ).astype(self.compute_dtype)
        self.b_pad = jnp.pad(
            b, ((0, 0), (0, self.n_pad - self.d_out))
        ).astype(jnp.float32)                             # bias stays f32

    def __call__(self, x_nchw):
        # glue: NCHW -> [B, C*H*W] row-major flatten (== torch.flatten(x, 1)).
        B = x_nchw.shape[0]
        x_flat = x_nchw.reshape(B, -1)

        # Sublane granularity of the *activation* dtype (x is cast to the
        # compute dtype inside the kernel, so no wrapper-side cast pass).
        sublane = max(8, 32 // jnp.dtype(x_flat.dtype).itemsize)
        tm = min(_MAX_TM, _round_up(B, sublane))
        m_pad = _round_up(B, tm)

        # Pad only when actually required -> aligned shapes skip the extra
        # (un-fusable) HBM write+read of the activations entirely.
        if (m_pad, self.k_pad) != x_flat.shape:
            x_p = jnp.pad(
                x_flat, ((0, m_pad - B), (0, self.k_pad - self.d_in)))
        else:
            x_p = x_flat

        tn = _pick_tn(self.n_pad, m_pad // tm)
        out_pad = _matmul_bias(x_p, self.w_pad, self.b_pad,
                               tm=tm, tn=tn, tk=self.tk)
        mu = out_pad[:B, :self.d_out]
        return {'param:mu': mu}

    @staticmethod
    def mean(params):
        return params['param:mu']

    @staticmethod
    def sample(params):
        return params['param:mu']

    @staticmethod
    def kl_divergence(params):
        # Matches the PyTorch spec (plain 0, not an array).
        return 0


if __name__ == "__main__":
    key = jax.random.PRNGKey(0)
    kx, kw, kb, kx2, kw2, kb2 = jax.random.split(key, 6)

    # ---- Case 1: demo shape, default bf16 weights (single-K-step kernel) ----
    B, C, H, W = 2, 4, 16, 16
    D_in = C * H * W          # 1024
    D_out = 32                # latent size

    x = jax.random.normal(kx, (B, C, H, W), dtype=jnp.float32)
    w = (jax.random.normal(kw, (D_in, D_out), dtype=jnp.float32)
         * (1.0 / jnp.sqrt(D_in)))
    b = jax.random.normal(kb, (1, D_out), dtype=jnp.float32) * 0.01
    ref = x.reshape(B, -1) @ w + b

    model_bf16 = ConditionalDiracDelta(w, b)                     # bf16 default
    params = model_bf16(x)
    mu = jax.block_until_ready(params['param:mu'])
    assert mu.shape == (B, D_out)
    # bf16 inputs to the MXU (f32 accumulation) -> loosened tolerance.
    assert jnp.allclose(mu, ref, atol=3e-2, rtol=3e-2)
    assert ConditionalDiracDelta.kl_divergence(params) == 0
    assert jnp.array_equal(ConditionalDiracDelta.mean(params), mu)
    assert jnp.array_equal(ConditionalDiracDelta.sample(params), mu)

    # ---- Case 2: explicit f32 compute path, tight tolerance ----
    model_f32 = ConditionalDiracDelta(w, b, compute_dtype=jnp.float32)
    mu_f32 = jax.block_until_ready(model_f32(x)['param:mu'])
    assert jnp.allclose(mu_f32, ref, atol=1e-4, rtol=1e-4)

    # ---- Case 3: wider input -> exercises the K-tiled accumulator kernel ----
    C2 = 9
    D_in2 = C2 * H * W        # 2304 > 2048 -> two K tiles of 1152
    D_out2 = 96
    x2 = jax.random.normal(kx2, (B, C2, H, W), dtype=jnp.float32)
    w2 = (jax.random.normal(kw2, (D_in2, D_out2), dtype=jnp.float32)
          * (1.0 / jnp.sqrt(D_in2)))
    b2 = jax.random.normal(kb2, (1, D_out2), dtype=jnp.float32) * 0.01
    ref2 = x2.reshape(B, -1) @ w2 + b2

    model2 = ConditionalDiracDelta(w2, b2)                       # bf16, multi-K
    mu2 = jax.block_until_ready(model2(x2)['param:mu'])
    assert mu2.shape == (B, D_out2)
    assert jnp.allclose(mu2, ref2, atol=3e-2, rtol=3e-2)

    print("KERNEL_OK")
</pallas_src>

<mosaic_0001>
module attributes {stable_mosaic.version = 11 : i64} {
  func.func @_mu_kernel_single_k(%arg0: i32, %arg1: i32, %arg2: memref<8x1024xf32, #tpu.memory_space<vmem>>, %arg3: memref<1024x128xbf16, #tpu.memory_space<vmem>>, %arg4: memref<1x128xf32, #tpu.memory_space<vmem>>, %arg5: memref<8x128xf32, #tpu.memory_space<vmem>>) attributes {dimension_semantics = [#tpu.dimension_semantics<parallel>, #tpu.dimension_semantics<parallel>], iteration_bounds = array<i64: 1, 1>, scalar_prefetch = 0 : i64, scratch_operands = 0 : i64, tpu.core_type = #tpu.core_type<tc>, window_params = [{transform_indices = @transform_0, window_bounds = array<i64: 8, 1024>}, {transform_indices = @transform_1, window_bounds = array<i64: 1024, 128>}, {transform_indices = @transform_2, window_bounds = array<i64: 1, 128>}, {transform_indices = @transform_3, window_bounds = array<i64: 8, 128>}]} {
    %c0 = arith.constant 0 : index
    %c0_0 = arith.constant 0 : index
    %0 = vector.load %arg2[%c0, %c0_0] : memref<8x1024xf32, #tpu.memory_space<vmem>>, vector<8x1024xf32>
    %1 = arith.truncf %0 : vector<8x1024xf32> to vector<8x1024xbf16>
    %c0_1 = arith.constant 0 : index
    %c0_2 = arith.constant 0 : index
    %2 = vector.load %arg3[%c0_1, %c0_2] : memref<1024x128xbf16, #tpu.memory_space<vmem>>, vector<1024x128xbf16>
    %cst = arith.constant dense<0.000000e+00> : vector<8x128xf32>
    %3 = tpu.matmul %1, %2, %cst {dimension_numbers = #tpu.dot_dimension_numbers<[1], [0], [0], [1], [0, 0, 1, 1], [], []>} : vector<8x1024xbf16>, vector<1024x128xbf16>, vector<8x128xf32> -> vector<8x128xf32>
    %c0_3 = arith.constant 0 : index
    %c0_4 = arith.constant 0 : index
    %4 = vector.load %arg4[%c0_3, %c0_4] : memref<1x128xf32, #tpu.memory_space<vmem>>, vector<1x128xf32>
    %5 = vector.broadcast %4 : vector<1x128xf32> to vector<8x128xf32>
    %6 = arith.addf %3, %5 : vector<8x128xf32>
    %c0_5 = arith.constant 0 : index
    %c0_6 = arith.constant 0 : index
    %7 = vector.load %arg5[%c0_5, %c0_6] : memref<8x128xf32, #tpu.memory_space<vmem>>, vector<8x128xf32>
    tpu.vector_store %arg5[%c0_5, %c0_6], %6 {strides = array<i32>} : memref<8x128xf32, #tpu.memory_space<vmem>>, vector<8x128xf32>,
    return
  }
  func.func @transform_0(%arg0: i32, %arg1: i32) -> (i32, i32) {
    %c0_i32 = arith.constant 0 : i32
    %c0_i32_0 = arith.constant 0 : i32
    return %arg0, %c0_i32 : i32, i32
  }
  func.func @transform_1(%arg0: i32, %arg1: i32) -> (i32, i32) {
    %c0_i32 = arith.constant 0 : i32
    %c0_i32_0 = arith.constant 0 : i32
    return %c0_i32, %arg1 : i32, i32
  }
  func.func @transform_2(%arg0: i32, %arg1: i32) -> (i32, i32) {
    %c0_i32 = arith.constant 0 : i32
    %c0_i32_0 = arith.constant 0 : i32
    return %c0_i32, %arg1 : i32, i32
  }
  func.func @transform_3(%arg0: i32, %arg1: i32) -> (i32, i32) {
    %c0_i32 = arith.constant 0 : i32
    return %arg0, %arg1 : i32, i32
  }
}

</mosaic_0001>

<bundles_post_ra>
// kernel: _matmul_bias.1
= control target key start
LH: loop header
LB: loop body
LE: loop exit
PB: predicated region body
PF: predicated region fallthrough
CT: control target
= control target key end

     0   :  { %8 = vsyncpa [#allocation3], 0  ;;  %s1119_s0 = inlined_call_operand.hbm [shape: f32[8,1024], index: 0, kind: input, shape index: {}]   ;;  %s1120_s1 = inlined_call_operand.hbm [shape: bf16[1024,128], index: 1, kind: input, shape index: {}]   ;;  %s1121_s2 = inlined_call_operand.vmem [shape: f32[1,128], index: 2, kind: input, shape index: {}]   ;;  %s1122_s3 = inlined_call_operand.hbm [shape: f32[8,128], index: 3, kind: output, shape index: {}]  }
   0x1   :  { %9 = vsyncpa [#allocation6], 0 }
   0x2   :  { %10 = vsyncpa [#allocation4], 0  ;;  %s1048_s12 = smov [#allocation2]   ;;  %s1049_s14 = smov [#allocation5]  }
   0x3   :  { %s17_s13 = sshll.u32 %s1048_s12, 4  ;;  %s26_s15 = sshll.u32 %s1049_s14, 4  ;;  %s18_s13 = int_to_ptr.vmem [resolvable:$true] %s17_s13  ;;  %s1073_s15 = int_to_ptr.vmem [resolvable:$true] %s26_s15 }
   0x4   :  { %s976_s18 = scalar_lea.hbm %s1119_s0, 1024 }
   0x5   :  { %p977_p0 = scmp.ne.s32.totalorder %s1119_s0, %s976_s18  ;;  %p980_p1 = scmp.lt.u32.totalorder %s976_s18, %s1119_s0 }
   0x7   :  { %p982_p2 = pnand %p980_p1, %p977_p0 }
   0x9   :  { %985 = shalt.err (!%p982_p2)
}
   0xa   :  { %s986_s23 = scalar_lea.vmem %s18_s13, 1024  ;;  %p991_p4 = scmp.lt.s32.totalorder %s18_s13, %s18_s13 }
   0xb   :  { %p987_p3 = scmp.ne.s32.totalorder %s18_s13, %s986_s23  ;;  %p992_p5 = scmp.lt.s32.totalorder %s986_s23, %s986_s23 }
   0xd   :  { %p993_p6 = por %p992_p5, %p991_p4 }
   0xf   :  { %p994_p7 = pnand %p993_p6, %p987_p3 }
  0x11   :  { %997 = shalt.err (!%p994_p7)
}
  0x12   :  { %20 = dma.hbm_to_vmem [thread:$0]  %s1119_s0, 1024, %s18_s13, [#allocation3]  }
  0x13   :  { %s998_s28 = scalar_lea.hbm %s1120_s1, 8192 }
  0x14   :  { %p999_p8 = scmp.ne.s32.totalorder %s1120_s1, %s998_s28  ;;  %p1002_p9 = scmp.lt.u32.totalorder %s998_s28, %s1120_s1 }
  0x16   :  { %p1004_p10 = pnand %p1002_p9, %p999_p8 }
  0x18   :  { %1007 = shalt.err (!%p1004_p10)
}
  0x19   :  { %s1008_s6 = scalar_lea.vmem %s1073_s15, 8192  ;;  %p1013_p12 = scmp.lt.s32.totalorder %s1073_s15, %s1073_s15 }
  0x1a   :  { %p1009_p11 = scmp.ne.s32.totalorder %s1073_s15, %s1008_s6  ;;  %p1014_p13 = scmp.lt.s32.totalorder %s1008_s6, %s1008_s6 }
  0x1c   :  { %p1015_p0 = por %p1014_p13, %p1013_p12 }
  0x1e   :  { %p1016_p1 = pnand %p1015_p0, %p1009_p11 }
  0x20   :  { %1019 = shalt.err (!%p1016_p1)
}
  0x21   :  { %s1050_s0 = smov 64   ;;  %s1051_s7 = smov 4  }
  0x22   :  { %32 = dma.hbm_to_vmem [thread:$0]  %s1120_s1, 8192, %s1073_s15, [#allocation6], %s1050_s0, %s1050_s0, %s1051_s7  }
  0x23   :  { %1042 = dma.done.wait [#allocation3], 1024  }
  0x24   :  { %1043 = vsyncadd [#allocation3], 4294966272 }
  0x25   :  { %1044 = dma.done.wait [#allocation6], 8192  }
  0x26   :  { %1045 = vsyncadd [#allocation6], 4294959104  ;;  %v912_v0 = vld [vmem:[#allocation5 + $0x40] sm:$0xff]   ;;  %v916_v4 = vld [vmem:[#allocation5 + $0x48] sm:$0xff]  }
  0x27   :  { %v913_v1 = vld [vmem:[#allocation5 + $0xc0] sm:$0xff]   ;;  %819 = vmatprep.subr.bf16.mxu0 %v912_v0  ;;  %v917_v5 = vld [vmem:[#allocation5 + $0xc8] sm:$0xff]   ;;  %v920_v8 = vld [vmem:[#allocation5 + $0x50] sm:$0xff]  }
  0x28   :  { %v914_v2 = vld [vmem:[#allocation5] sm:$0xff]   ;;  %841 = vmatprep.subr.bf16.mxu1 %v913_v1  ;;  %v918_v6 = vld [vmem:[#allocation5 + $0x8] sm:$0xff]   ;;  %v921_v9 = vld [vmem:[#allocation5 + $0xd0] sm:$0xff]  }
  0x29   :  { %v915_v3 = vld [vmem:[#allocation5 + $0x80] sm:$0xff]   ;;  %820 = vmatpush3.bf16.msra.mxu0 %v914_v2  ;;  %v919_v7 = vld [vmem:[#allocation5 + $0x88] sm:$0xff]   ;;  %v922_v10 = vld [vmem:[#allocation5 + $0x10] sm:$0xff]  }
  0x2a   :  { %842 = vmatpush3.bf16.msra.mxu1 %v915_v3  ;;  %821 = vmatprep.subr.bf16.mxu0 %v916_v4  ;;  %v923_v11 = vld [vmem:[#allocation5 + $0x90] sm:$0xff]   ;;  %v924_v12 = vld [vmem:[#allocation5 + $0x58] sm:$0xff]   ;;  %v928_v16 = vld [vmem:[#allocation5 + $0x60] sm:$0xff]  }
  0x2b   :  { %843 = vmatprep.subr.bf16.mxu1 %v917_v5  ;;  %v925_v13 = vld [vmem:[#allocation5 + $0xd8] sm:$0xff]   ;;  %v929_v17 = vld [vmem:[#allocation5 + $0xe0] sm:$0xff]   ;;  %v932_v20 = vld [vmem:[#allocation5 + $0x68] sm:$0xff]  }
  0x2c   :  { %v926_v14 = vld [vmem:[#allocation5 + $0x18] sm:$0xff]   ;;  %v930_v18 = vld [vmem:[#allocation5 + $0x20] sm:$0xff]   ;;  %v933_v21 = vld [vmem:[#allocation5 + $0xe8] sm:$0xff]  }
  0x2d   :  { %822 = vmatpush3.bf16.msra.mxu0 %v918_v6  ;;  %v927_v15 = vld [vmem:[#allocation5 + $0x98] sm:$0xff]   ;;  %v931_v19 = vld [vmem:[#allocation5 + $0xa0] sm:$0xff]   ;;  %v934_v22 = vld [vmem:[#allocation5 + $0x28] sm:$0xff]  }
  0x2e   :  { %844 = vmatpush3.bf16.msra.mxu1 %v919_v7  ;;  %823 = vmatprep.subr.bf16.mxu0 %v920_v8  ;;  %v935_v23 = vld [vmem:[#allocation5 + $0xa8] sm:$0xff]   ;;  %v936_v24 = vld [vmem:[#allocation5 + $0x70] sm:$0xff]   ;;  %v940_v28 = vld [vmem:[#allocation5 + $0x78] sm:$0xff]  }
  0x2f   :  { %845 = vmatprep.subr.bf16.mxu1 %v921_v9  ;;  %v937_v25 = vld [vmem:[#allocation5 + $0xf0] sm:$0xff]   ;;  %v941_v29 = vld [vmem:[#allocation5 + $0xf8] sm:$0xff]   ;;  %v43_v32 = vld [vmem:[#allocation2 + $0x8] sm:$0xff] }
  0x30   :  { %v938_v26 = vld [vmem:[#allocation5 + $0x30] sm:$0xff]   ;;  %v942_v30 = vld [vmem:[#allocation5 + $0x38] sm:$0xff]   ;;  %v42_v34 = vld [vmem:[#allocation2] sm:$0xff]  ;;  %v51_v35 = vpack.c.bf16 %v43_v32, %v43_v32 }
  0x31   :  { %824 = vmatpush3.bf16.msra.mxu0 %v922_v10  ;;  %v939_v27 = vld [vmem:[#allocation5 + $0xb0] sm:$0xff]   ;;  %v943_v31 = vld [vmem:[#allocation5 + $0xb8] sm:$0xff]   ;;  %v50_v37 = vpack.c.bf16 %v42_v34, %v42_v34  ;;  %v944_v40 = vld [vmem:[#allocation5 + $0x140] sm:$0xff]  }
  0x32   :  { %846 = vmatpush3.bf16.msra.mxu1 %v923_v11  ;;  %825 = vmatprep.subr.bf16.mxu0 %v924_v12  ;;  %v45_v33 = vld [vmem:[#allocation2 + $0x18] sm:$0xff]  ;;  %v44_v38 = vld [vmem:[#allocation2 + $0x10] sm:$0xff]  ;;  %v945_v41 = vld [vmem:[#allocation5 + $0x1c0] sm:$0xff]  }
  0x33   :  { %847 = vmatprep.subr.bf16.mxu1 %v925_v13  ;;  %v53_v36 = vpack.c.bf16 %v45_v33, %v45_v33  ;;  %v52_v39 = vpack.c.bf16 %v44_v38, %v44_v38  ;;  %609 = vmatprep.mubr.bf16.mxu0 %v51_v35  ;;  %v946_v42 = vld [vmem:[#allocation5 + $0x100] sm:$0xff]   ;;  %v948_v44 = vld [vmem:[#allocation5 + $0x148] sm:$0xff]   ;;  %v952_v48 = vld [vmem:[#allocation5 + $0x150] sm:$0xff]  }
  0x34   :  { %v947_v43 = vld [vmem:[#allocation5 + $0x180] sm:$0xff]   ;;  %v949_v45 = vld [vmem:[#allocation5 + $0x1c8] sm:$0xff]   ;;  %v953_v49 = vld [vmem:[#allocation5 + $0x1d0] sm:$0xff]  }
  0x35   :  { %826 = vmatpush3.bf16.msra.mxu0 %v926_v14  ;;  %649 = vmatprep.mubr.bf16.mxu1 %v53_v36  ;;  %v950_v46 = vld [vmem:[#allocation5 + $0x108] sm:$0xff]   ;;  %v954_v50 = vld [vmem:[#allocation5 + $0x110] sm:$0xff]   ;;  %v956_v52 = vld [vmem:[#allocation5 + $0x158] sm:$0xff]  }
  0x36   :  { %848 = vmatpush3.bf16.msra.mxu1 %v927_v15  ;;  %827 = vmatprep.subr.bf16.mxu0 %v928_v16  ;;  %v951_v47 = vld [vmem:[#allocation5 + $0x188] sm:$0xff]   ;;  %v955_v51 = vld [vmem:[#allocation5 + $0x190] sm:$0xff]   ;;  %v957_v53 = vld [vmem:[#allocation5 + $0x1d8] sm:$0xff]  }
  0x37   :  { %849 = vmatprep.subr.bf16.mxu1 %v929_v17  ;;  %v958_v54 = vld [vmem:[#allocation5 + $0x118] sm:$0xff]   ;;  %v960_v56 = vld [vmem:[#allocation5 + $0x160] sm:$0xff]   ;;  %v964_v60 = vld [vmem:[#allocation5 + $0x168] sm:$0xff]  }
  0x38   :  { %v959_v55 = vld [vmem:[#allocation5 + $0x198] sm:$0xff]   ;;  %v961_v57 = vld [vmem:[#allocation5 + $0x1e0] sm:$0xff]   ;;  %v965_v61 = vld [vmem:[#allocation5 + $0x1e8] sm:$0xff]  }
  0x39   :  { %828 = vmatpush3.bf16.msra.mxu0 %v930_v18  ;;  %v962_v58 = vld [vmem:[#allocation5 + $0x120] sm:$0xff]   ;;  %v966_v62 = vld [vmem:[#allocation5 + $0x128] sm:$0xff]   ;;  %v968_v0 = vld [vmem:[#allocation5 + $0x170] sm:$0xff]  }
  0x3a   :  { %850 = vmatpush3.bf16.msra.mxu1 %v931_v19  ;;  %829 = vmatprep.subr.bf16.mxu0 %v932_v20  ;;  %v963_v59 = vld [vmem:[#allocation5 + $0x1a0] sm:$0xff]   ;;  %v967_v63 = vld [vmem:[#allocation5 + $0x1a8] sm:$0xff]   ;;  %v969_v1 = vld [vmem:[#allocation5 + $0x1f0] sm:$0xff]  }
  0x3b   :  { %851 = vmatprep.subr.bf16.mxu1 %v933_v21  ;;  %v970_v2 = vld [vmem:[#allocation5 + $0x130] sm:$0xff]   ;;  %v972_v4 = vld [vmem:[#allocation5 + $0x178] sm:$0xff]   ;;  %v47_v8 = vld [vmem:[#allocation2 + $0x28] sm:$0xff] }
  0x3c   :  { %v971_v3 = vld [vmem:[#allocation5 + $0x1b0] sm:$0xff]   ;;  %v973_v5 = vld [vmem:[#allocation5 + $0x1f8] sm:$0xff]   ;;  %v55_v10 = vpack.c.bf16 %v47_v8, %v47_v8  ;;  %v46_v12 = vld [vmem:[#allocation2 + $0x20] sm:$0xff] }
  0x3d   :  { %830 = vmatpush3.bf16.msra.mxu0 %v934_v22  ;;  %v974_v6 = vld [vmem:[#allocation5 + $0x138] sm:$0xff]   ;;  %v48_v13 = vld [vmem:[#allocation2 + $0x30] sm:$0xff]  ;;  %v54_v14 = vpack.c.bf16 %v46_v12, %v46_v12  ;;  %v754_v18 = vld [vmem:[%s1121_s2] ss:$0 sm:$0xff]  ;;  %s1052_s2 = smov [#allocation7]  }
  0x3e   :  { %852 = vmatpush3.bf16.msra.mxu1 %v935_v23  ;;  %831 = vmatprep.subr.bf16.mxu0 %v936_v24  ;;  %v975_v7 = vld [vmem:[#allocation5 + $0x1b8] sm:$0xff]   ;;  %v56_v15 = vpack.c.bf16 %v48_v13, %v48_v13  ;;  %s744_s11 = sshll.u32 %s1052_s2, 4  ;;  %s745_s11 = int_to_ptr.vmem [resolvable:$true] %s744_s11 }
  0x3f   :  { %853 = vmatprep.subr.bf16.mxu1 %v937_v25  ;;  %v49_v9 = vld [vmem:[#allocation2 + $0x38] sm:$0xff]  ;;  %s1020_s12 = scalar_lea.vmem %s745_s11, 128  ;;  %p1025_p3 = scmp.lt.s32.totalorder %s745_s11, %s745_s11 }
  0x40   :  { %v57_v11 = vpack.c.bf16 %v49_v9, %v49_v9  ;;  %p1021_p2 = scmp.ne.s32.totalorder %s745_s11, %s1020_s12  ;;  %p1026_p4 = scmp.lt.s32.totalorder %s1020_s12, %s1020_s12 }
  0x41   :  { %832 = vmatpush3.bf16.msra.mxu0 %v938_v26 }
  0x42   :  { %854 = vmatpush3.bf16.msra.mxu1 %v939_v27  ;;  %833 = vmatprep.subr.bf16.mxu0 %v940_v28  ;;  %p1027_p5 = por %p1026_p4, %p1025_p3 }
  0x43   :  { %855 = vmatprep.subr.bf16.mxu1 %v941_v29 }
  0x44   :  { %p1028_p6 = pnand %p1027_p5, %p1021_p2 }
  0x45   :  { %834 = vmatpush3.bf16.msra.mxu0 %v942_v30 }
  0x46   :  { %856 = vmatpush3.bf16.msra.mxu1 %v943_v31  ;;  %863 = vmatprep.subr.bf16.mxu0 %v944_v40 }
  0x47   :  { %885 = vmatprep.subr.bf16.mxu1 %v945_v41 }
  0x48   :  { %610 = vmatmul.mubr.bf16.vlgmr.msra.gmra.mrb[0].mxu0 %v50_v37 }
  0x49   :  { %650 = vmatmul.mubr.bf16.vlgmr.msra.gmra.mrb[0].mxu1 %v52_v39  ;;  %864 = vmatpush3.bf16.msra.mxu0 %v946_v42 }
  0x4a   :  { %886 = vmatpush3.bf16.msra.mxu1 %v947_v43  ;;  %865 = vmatprep.subr.bf16.mxu0 %v948_v44 }
  0x4b   :  { %887 = vmatprep.subr.bf16.mxu1 %v949_v45  ;;  %689 = vmatprep.mubr.bf16.mxu0 %v55_v10 }
  0x4c   :  { %729 = vmatprep.mubr.bf16.mxu1 %v57_v11 }
  0x4d   :  { %866 = vmatpush3.bf16.msra.mxu0 %v950_v46 }
  0x4e   :  { %888 = vmatpush3.bf16.msra.mxu1 %v951_v47  ;;  %867 = vmatprep.subr.bf16.mxu0 %v952_v48 }
  0x4f   :  { %889 = vmatprep.subr.bf16.mxu1 %v953_v49 }
  0x51   :  { %868 = vmatpush3.bf16.msra.mxu0 %v954_v50 }
  0x52   :  { %890 = vmatpush3.bf16.msra.mxu1 %v955_v51  ;;  %869 = vmatprep.subr.bf16.mxu0 %v956_v52 }
  0x53   :  { %891 = vmatprep.subr.bf16.mxu1 %v957_v53 }
  0x55   :  { %870 = vmatpush3.bf16.msra.mxu0 %v958_v54 }
  0x56   :  { %892 = vmatpush3.bf16.msra.mxu1 %v959_v55  ;;  %871 = vmatprep.subr.bf16.mxu0 %v960_v56 }
  0x57   :  { %893 = vmatprep.subr.bf16.mxu1 %v961_v57 }
  0x59   :  { %872 = vmatpush3.bf16.msra.mxu0 %v962_v58 }
  0x5a   :  { %894 = vmatpush3.bf16.msra.mxu1 %v963_v59  ;;  %873 = vmatprep.subr.bf16.mxu0 %v964_v60 }
  0x5b   :  { %895 = vmatprep.subr.bf16.mxu1 %v965_v61 }
  0x5d   :  { %874 = vmatpush3.bf16.msra.mxu0 %v966_v62 }
  0x5e   :  { %896 = vmatpush3.bf16.msra.mxu1 %v967_v63  ;;  %875 = vmatprep.subr.bf16.mxu0 %v968_v0 }
  0x5f   :  { %897 = vmatprep.subr.bf16.mxu1 %v969_v1 }
  0x61   :  { %876 = vmatpush3.bf16.msra.mxu0 %v970_v2 }
  0x62   :  { %898 = vmatpush3.bf16.msra.mxu1 %v971_v3  ;;  %877 = vmatprep.subr.bf16.mxu0 %v972_v4 }
  0x63   :  { %899 = vmatprep.subr.bf16.mxu1 %v973_v5 }
  0x65   :  { %878 = vmatpush3.bf16.msra.mxu0 %v974_v6 }
  0x66   :  { %900 = vmatpush3.bf16.msra.mxu1 %v975_v7 }
  0x68   :  { %690 = vmatmul.mubr.bf16.vlgmr.msra.gmra.mrb[4].mxu0 %v54_v14 }
  0x69   :  { %730 = vmatmul.mubr.bf16.vlgmr.msra.gmra.mrb[4].mxu1 %v56_v15 }
 0x11b   :  { %v835_v16 = vpop.f32.mrb[0].mxu0 }
 0x11c   :  { %v857_v17 = vpop.f32.mrb[0].mxu1  ;;  %v836_v19 = vpop.f32.mrb[1].mxu0 }
 0x11d   :  { %v858_v20 = vpop.f32.mrb[1].mxu1  ;;  %v837_v21 = vadd.f32 %v836_v19, %v835_v16  ;;  %v838_v23 = vpop.f32.mrb[2].mxu0 }
 0x11e   :  { %v859_v22 = vadd.f32 %v858_v20, %v857_v17  ;;  %v860_v24 = vpop.f32.mrb[2].mxu1  ;;  %v839_v25 = vpop.f32.mrb[3].mxu0 }
 0x11f   :  { %v861_v26 = vpop.f32.mrb[3].mxu1  ;;  %v612_v27 = vadd.f32 %v837_v21, %v754_v18 }
 0x121   :  { %v652_v28 = vadd.f32 %v859_v22, %v612_v27 }
 0x13b   :  { %v879_v29 = vpop.f32.mrb[4].mxu0 }
 0x13c   :  { %v901_v30 = vpop.f32.mrb[4].mxu1  ;;  %v880_v31 = vpop.f32.mrb[5].mxu0 }
 0x13d   :  { %v881_v32 = vadd.f32 %v880_v31, %v879_v29  ;;  %v902_v33 = vpop.f32.mrb[5].mxu1  ;;  %v882_v34 = vpop.f32.mrb[6].mxu0 }
 0x13e   :  { %v903_v35 = vadd.f32 %v902_v33, %v901_v30  ;;  %v904_v36 = vpop.f32.mrb[6].mxu1  ;;  %v883_v37 = vpop.f32.mrb[7].mxu0 }
 0x13f   :  { %v692_v38 = vadd.f32 %v881_v32, %v652_v28  ;;  %v905_v39 = vpop.f32.mrb[7].mxu1 }
 0x141   :  { %v732_v40 = vadd.f32 %v903_v35, %v692_v38 }
 0x143   :  { %737 = vst [vmem:[#allocation7] sm:$0xff] %v732_v40 }
 0x144   :  { %1031 = shalt.err (!%p1028_p6)
}
 0x145   :  { %s1032_s15 = scalar_lea.hbm %s1122_s3, 128 }
 0x146   :  { %p1033_p7 = scmp.ne.s32.totalorder %s1122_s3, %s1032_s15  ;;  %p1036_p8 = scmp.lt.u32.totalorder %s1032_s15, %s1122_s3 }
 0x148   :  { %p1038_p9 = pnand %p1036_p8, %p1033_p7 }
 0x14a   :  { %1041 = shalt.err (!%p1038_p9)
}
 0x14b   :  { %747 = dma.vmem_to_hbm [thread:$0]  %s745_s11, 128, %s1122_s3, [#allocation4]  }
 0x14c   :  { %1046 = dma.done.wait [#allocation4], 128  }
 0x14d   :  { %1047 = vsyncadd [#allocation4], 4294967168 }
 0x14e   :  { %751 = vsyncpa [#allocation3], 1 }
 0x14f   :  { %752 = vsyncpa [#allocation6], 1 }
 0x150   :  { %753 = vsyncpa [#allocation4], 1 }

</bundles_post_ra>
